<compile_context>
chip_gen: v5e
topology: v5e:2x2
jax: 0.10.0
libtpu: 0.0.40
codegen_flags: <defaults>
</compile_context>

<pallas_src>
import functools

import numpy as np
import jax
import jax.numpy as jnp
from jax.experimental import pallas as pl
from jax.experimental.pallas import tpu as pltpu

KH = KW = 4
STRIDE = 3
GROUPS = 3
CP = 16                    # per-phase Cout padded 15 -> 16
NPH = STRIDE * STRIDE      # 9 output phases (ph, pw)
NCOL = NPH * CP            # 144 lane-dense output columns


def _round_up(x, m):
    return -(-x // m) * m


# ---------------- fused Pallas kernel: GEMM + bias + where, single store ----------------

def _kernel(x_ref, w_ref, b_ref, o_ref):
    # (block_m, 48) @ (48, 144) on the MXU; the transposed-conv overlap-add is folded
    # into the weight columns, so the contraction itself performs the fold.
    m1 = jnp.dot(x_ref[...], w_ref[...], preferred_element_type=jnp.float32)
    m1 = m1 + b_ref[...]                             # (1, 144) broadcasts in-register
    o_ref[...] = jnp.where(m1 > 0, m1, m1 * 8.0)     # one lane-dense (>=128) store


# ---------------- host-side (one-off) weight folding ----------------

def fold_params(weight, bias):
    """ConvTranspose2d(k=4, s=3, groups=3, bias) -> phase-decomposed GEMM parameters.

    out[n, 3a+ph, 3b+pw, co] =
        bias[co] + sum_{dh,dw in {0,1}} sum_ci x[n, a-dh, b-dw, ci]
                   * Wf[(dh*2+dw)*Cin + ci, (ph*3+pw)*CP + co]
    with kh = ph + 3*dh, kw = pw + 3*dw (only valid taps populated; group structure
    realised as structural zeros).  Each weight element lands in exactly one
    (dh,ph)x(dw,pw) slot, so the overlap-add happens inside the GEMM contraction.
    """
    w = np.asarray(weight, np.float32)               # (Cin, Cout/groups, 4, 4)
    b = np.asarray(bias, np.float32)
    cin, cout_g = w.shape[0], w.shape[1]
    cin_g = cin // GROUPS
    cout = cout_g * GROUPS

    wf = np.zeros((4 * cin, NCOL), np.float32)
    for kh in range(KH):
        dh, ph = (1, 0) if kh == STRIDE else (0, kh)
        for kw in range(KW):
            dw, pw = (1, 0) if kw == STRIDE else (0, kw)
            r0 = (dh * 2 + dw) * cin
            c0 = (ph * STRIDE + pw) * CP
            for ci in range(cin):
                g = ci // cin_g
                wf[r0 + ci, c0 + g * cout_g: c0 + (g + 1) * cout_g] = w[ci, :, kh, kw]

    b_pad = np.zeros((CP,), np.float32)
    b_pad[:cout] = b
    bt = np.tile(b_pad, NPH).reshape(1, NCOL)
    return jnp.asarray(wf), jnp.asarray(bt)


# ---------------- jitted apply ----------------

@functools.partial(jax.jit, static_argnames=("cout",))
def conv_transpose2d_where(x_nchw, wf, bt, *, cout):
    n, cin, hin, win = x_nchw.shape
    hout = (hin - 1) * STRIDE + KH
    wout = (win - 1) * STRIDE + KW
    hb, wb = hin + 1, win + 1

    # 2x2 im2col, channels-last: x_cols[(n,a,b), (dh*2+dw)*cin+ci] = x[n, ci, a-dh, b-dw]
    x_nhwc = jnp.transpose(x_nchw, (0, 2, 3, 1)).astype(jnp.float32)
    xp = jnp.pad(x_nhwc, ((0, 0), (1, 1), (1, 1), (0, 0)))
    cols = [xp[:, 1 - dh:1 - dh + hb, 1 - dw:1 - dw + wb, :]
            for dh in range(2) for dw in range(2)]
    x_cols = jnp.concatenate(cols, axis=-1).reshape(n * hb * wb, 4 * cin)
    # NOTE: casting x_cols/wf to bf16 (keeping f32 accumulation) would halve GEMM operand
    # bytes on v6e/v7x; kept f32 here so the strict 1e-4 self-check vs the f32 XLA
    # reference holds — at K<=48 the cost difference is negligible.

    M, K = x_cols.shape
    if M <= 2048:
        block_m = _round_up(M, 8)      # single grid step at small sizes
    else:
        block_m = 1024                 # parallel M-grid: v7x's 2 TCs split the work;
                                       # ~0.7 MiB/step << 32 MiB scoped VMEM
    m_pad = _round_up(M, block_m)
    if m_pad != M:
        x_cols = jnp.pad(x_cols, ((0, m_pad - M), (0, 0)))

    out = pl.pallas_call(
        _kernel,
        out_shape=jax.ShapeDtypeStruct((m_pad, NCOL), jnp.float32),
        grid_spec=pltpu.PrefetchScalarGridSpec(
            num_scalar_prefetch=0,
            grid=(m_pad // block_m,),
            in_specs=[pl.BlockSpec((block_m, K), lambda i: (i, 0)),
                      pl.BlockSpec((K, NCOL), lambda i: (0, 0)),
                      pl.BlockSpec((1, NCOL), lambda i: (0, 0))],
            out_specs=pl.BlockSpec((block_m, NCOL), lambda i: (i, 0)),
        ),
        compiler_params=pltpu.CompilerParams(
            dimension_semantics=("parallel",)),
    )(x_cols, wf, bt)

    # tiny XLA glue: phase unpack -> crop padding -> NCHW
    out = out[:M].reshape(n, hb, wb, STRIDE, STRIDE, CP)
    out = jnp.transpose(out, (0, 1, 3, 2, 4, 5)).reshape(n, hb * STRIDE, wb * STRIDE, CP)
    out = out[:, :hout, :wout, :cout]
    return jnp.transpose(out, (0, 3, 1, 2))                       # NCHW


# ---------------- pure-JAX reference (correctness check only) ----------------

def reference(x_nchw, weight, bias):
    cin = x_nchw.shape[1]
    cin_g = cin // GROUPS
    cout_g = weight.shape[1]
    cout = cout_g * GROUPS
    w_conv = weight.astype(jnp.float32).reshape(GROUPS, cin_g, cout_g, KH, KW)
    w_conv = jnp.transpose(w_conv, (0, 2, 1, 3, 4)).reshape(cout, cin_g, KH, KW)
    w_conv = w_conv[:, :, ::-1, ::-1]
    m1 = jax.lax.conv_general_dilated(
        x_nchw.astype(jnp.float32), w_conv,
        window_strides=(1, 1),
        padding=[(KH - 1, KH - 1), (KW - 1, KW - 1)],
        lhs_dilation=(STRIDE, STRIDE),
        dimension_numbers=("NCHW", "OIHW", "NCHW"),
        feature_group_count=GROUPS)
    m1 = m1 + bias.astype(jnp.float32).reshape(1, cout, 1, 1)
    return jnp.where(m1 > 0, m1, m1 * 8.0)


if __name__ == "__main__":
    key = jax.random.PRNGKey(0)
    kx, kw_, kb = jax.random.split(key, 3)

    N, CIN, HIN, WIN = 2, 12, 8, 8     # small NCHW input consistent with the module
    COUT = 15                          # groups=3 -> 5 output channels per group

    x = jax.random.normal(kx, (N, CIN, HIN, WIN), jnp.float32)
    weight = jax.random.normal(kw_, (CIN, COUT // GROUPS, KH, KW), jnp.float32) * 0.1
    bias = jax.random.normal(kb, (COUT,), jnp.float32) * 0.1

    wf, bt = fold_params(weight, bias)
    out = jax.block_until_ready(conv_transpose2d_where(x, wf, bt, cout=COUT))
    ref = jax.block_until_ready(reference(x, weight, bias))

    assert out.shape == ref.shape, (out.shape, ref.shape)
    np.testing.assert_allclose(np.asarray(out), np.asarray(ref), rtol=1e-4, atol=1e-4)

    print("KERNEL_OK")
</pallas_src>

<mosaic_0001>
module attributes {stable_mosaic.version = 11 : i64} {
  func.func @_kernel(%arg0: i32, %arg1: memref<168x48xf32, #tpu.memory_space<vmem>>, %arg2: memref<48x144xf32, #tpu.memory_space<vmem>>, %arg3: memref<1x144xf32, #tpu.memory_space<vmem>>, %arg4: memref<168x144xf32, #tpu.memory_space<vmem>>) attributes {dimension_semantics = [#tpu.dimension_semantics<parallel>], iteration_bounds = array<i64: 1>, scalar_prefetch = 0 : i64, scratch_operands = 0 : i64, tpu.core_type = #tpu.core_type<tc>, window_params = [{transform_indices = @transform_0, window_bounds = array<i64: 168, 48>}, {pipeline_mode = #tpu.pipeline_mode<synchronous>, transform_indices = @transform_1, window_bounds = array<i64: 48, 144>}, {pipeline_mode = #tpu.pipeline_mode<synchronous>, transform_indices = @transform_2, window_bounds = array<i64: 1, 144>}, {transform_indices = @transform_3, window_bounds = array<i64: 168, 144>}]} {
    %c0 = arith.constant 0 : index
    %c0_0 = arith.constant 0 : index
    %0 = vector.load %arg1[%c0, %c0_0] : memref<168x48xf32, #tpu.memory_space<vmem>>, vector<168x48xf32>
    %c0_1 = arith.constant 0 : index
    %c0_2 = arith.constant 0 : index
    %1 = vector.load %arg2[%c0_1, %c0_2] : memref<48x144xf32, #tpu.memory_space<vmem>>, vector<48x144xf32>
    %cst = arith.constant dense<0.000000e+00> : vector<168x144xf32>
    %2 = tpu.matmul %0, %1, %cst {dimension_numbers = #tpu.dot_dimension_numbers<[1], [0], [0], [1], [0, 0, 1, 1], [], []>} : vector<168x48xf32>, vector<48x144xf32>, vector<168x144xf32> -> vector<168x144xf32>
    %c0_3 = arith.constant 0 : index
    %c0_4 = arith.constant 0 : index
    %3 = vector.load %arg3[%c0_3, %c0_4] : memref<1x144xf32, #tpu.memory_space<vmem>>, vector<1x144xf32>
    %4 = vector.broadcast %3 : vector<1x144xf32> to vector<168x144xf32>
    %5 = arith.addf %2, %4 : vector<168x144xf32>
    %cst_5 = arith.constant 0.000000e+00 : f32
    %6 = vector.broadcast %cst_5 : f32 to vector<168x144xf32>
    %7 = arith.cmpf ogt, %5, %6 : vector<168x144xf32>
    %cst_6 = arith.constant 8.000000e+00 : f32
    %8 = vector.broadcast %cst_6 : f32 to vector<168x144xf32>
    %9 = arith.mulf %5, %8 : vector<168x144xf32>
    %10 = arith.select %7, %5, %9 : vector<168x144xi1>, vector<168x144xf32>
    %c0_7 = arith.constant 0 : index
    %c0_8 = arith.constant 0 : index
    %11 = vector.load %arg4[%c0_7, %c0_8] : memref<168x144xf32, #tpu.memory_space<vmem>>, vector<168x144xf32>
    tpu.vector_store %arg4[%c0_7, %c0_8], %10 {strides = array<i32>} : memref<168x144xf32, #tpu.memory_space<vmem>>, vector<168x144xf32>,
    return
  }
  func.func @transform_0(%arg0: i32) -> (i32, i32) {
    %c0_i32 = arith.constant 0 : i32
    %c0_i32_0 = arith.constant 0 : i32
    return %arg0, %c0_i32 : i32, i32
  }
  func.func @transform_1(%arg0: i32) -> (i32, i32) {
    %c0_i32 = arith.constant 0 : i32
    %c0_i32_0 = arith.constant 0 : i32
    %c0_i32_1 = arith.constant 0 : i32
    return %c0_i32, %c0_i32_0 : i32, i32
  }
  func.func @transform_2(%arg0: i32) -> (i32, i32) {
    %c0_i32 = arith.constant 0 : i32
    %c0_i32_0 = arith.constant 0 : i32
    %c0_i32_1 = arith.constant 0 : i32
    return %c0_i32, %c0_i32_0 : i32, i32
  }
  func.func @transform_3(%arg0: i32) -> (i32, i32) {
    %c0_i32 = arith.constant 0 : i32
    %c0_i32_0 = arith.constant 0 : i32
    return %arg0, %c0_i32 : i32, i32
  }
}

</mosaic_0001>

<bundles_post_ra>
// kernel: conv_transpose2d_where.1
= control target key start
LH: loop header
LB: loop body
LE: loop exit
PB: predicated region body
PF: predicated region fallthrough
CT: control target
= control target key end

     0   :  { %vm53_vm0 = vcmask 392192   ;;  %vm404_vm3 = vcmask 130048   ;;  %s861_s1 = inlined_call_operand.vmem [shape: f32[48,144], index: 1, kind: input, shape index: {}]   ;;  %s862_s0 = inlined_call_operand.vmem [shape: f32[168,48], index: 0, kind: input, shape index: {}]   ;;  %s863_s2 = inlined_call_operand.vmem [shape: f32[1,144], index: 2, kind: input, shape index: {}]   ;;  %s864_s3 = inlined_call_operand.vmem [shape: f32[168,144], index: 3, kind: output, shape index: {}]  }
   0x1   :  { %v45_v0 = vld [vmem:[%s861_s1 + $0x50] sm:$0xff]  ;;  %v46_v1 = vld [vmem:[%s861_s1 + $0x58] sm:$0xff]  ;;  %v43_v2 = vld [vmem:[%s861_s1 + $0x40] sm:$0xff] }
   0x2   :  { %127 = vmatpush.msra.mxu0 %v45_v0  ;;  %492 = vmatpush.msra.mxu2 %v45_v0  ;;  %v44_v3 = vld [vmem:[%s861_s1 + $0x48] sm:$0xff]  ;;  %v41_v4 = vld [vmem:[%s861_s1 + $0x30] sm:$0xff]  ;;  %v42_v5 = vld [vmem:[%s861_s1 + $0x38] sm:$0xff] }
   0x3   :  { %207 = vmatpush.msra.mxu1 %v46_v1  ;;  %498 = vmatpush.msra.mxu3 %v46_v1  ;;  %v39_v6 = vld [vmem:[%s861_s1 + $0x20] sm:$0xff]  ;;  %v40_v7 = vld [vmem:[%s861_s1 + $0x28] sm:$0xff]  ;;  %v37_v8 = vld [vmem:[%s861_s1 + $0x10] sm:$0xff] }
   0x4   :  { %128 = vmatpush.msra.mxu0 %v43_v2  ;;  %493 = vmatpush.msra.mxu2 %v43_v2  ;;  %v38_v9 = vld [vmem:[%s861_s1 + $0x18] sm:$0xff]  ;;  %v35_v10 = vld [vmem:[%s861_s1] sm:$0xff]  ;;  %v36_v11 = vld [vmem:[%s861_s1 + $0x8] sm:$0xff] }
   0x5   :  { %208 = vmatpush.msra.mxu1 %v44_v3  ;;  %499 = vmatpush.msra.mxu3 %v44_v3  ;;  %v14_v12 = vld [vmem:[%s862_s0] sm:$0xff]  ;;  %v25_v13 = vld [vmem:[%s862_s0 + $0x58] sm:$0xff]  ;;  %v15_v14 = vld [vmem:[%s862_s0 + $0x8] sm:$0xff] }
   0x6   :  { %129 = vmatpush.msra.mxu0 %v41_v4  ;;  %494 = vmatpush.msra.mxu2 %v41_v4  ;;  %v26_v15 = vld [vmem:[%s862_s0 + $0x60] sm:$0xff]  ;;  %v16_v16 = vld [vmem:[%s862_s0 + $0x10] sm:$0xff]  ;;  %v27_v17 = vld [vmem:[%s862_s0 + $0x68] sm:$0xff] }
   0x7   :  { %209 = vmatpush.msra.mxu1 %v42_v5  ;;  %500 = vmatpush.msra.mxu3 %v42_v5  ;;  %v17_v18 = vld [vmem:[%s862_s0 + $0x18] sm:$0xff]  ;;  %v28_v19 = vld [vmem:[%s862_s0 + $0x70] sm:$0xff]  ;;  %v18_v20 = vld [vmem:[%s862_s0 + $0x20] sm:$0xff] }
   0x8   :  { %130 = vmatpush.msra.mxu0 %v39_v6  ;;  %495 = vmatpush.msra.mxu2 %v39_v6  ;;  %v29_v21 = vld [vmem:[%s862_s0 + $0x78] sm:$0xff]  ;;  %v19_v22 = vld [vmem:[%s862_s0 + $0x28] sm:$0xff]  ;;  %v30_v23 = vld [vmem:[%s862_s0 + $0x80] sm:$0xff] }
   0x9   :  { %210 = vmatpush.msra.mxu1 %v40_v7  ;;  %501 = vmatpush.msra.mxu3 %v40_v7  ;;  %v20_v24 = vld [vmem:[%s862_s0 + $0x30] sm:$0xff]  ;;  %v31_v25 = vld [vmem:[%s862_s0 + $0x88] sm:$0xff]  ;;  %v21_v26 = vld [vmem:[%s862_s0 + $0x38] sm:$0xff] }
   0xa   :  { %131 = vmatpush.msra.mxu0 %v37_v8  ;;  %496 = vmatpush.msra.mxu2 %v37_v8  ;;  %v32_v27 = vld [vmem:[%s862_s0 + $0x90] sm:$0xff]  ;;  %v22_v28 = vld [vmem:[%s862_s0 + $0x40] sm:$0xff]  ;;  %v33_v29 = vld [vmem:[%s862_s0 + $0x98] sm:$0xff] }
   0xb   :  { %211 = vmatpush.msra.mxu1 %v38_v9  ;;  %502 = vmatpush.msra.mxu3 %v38_v9  ;;  %v23_v30 = vld [vmem:[%s862_s0 + $0x48] sm:$0xff]  ;;  %v34_v31 = vld [vmem:[%s862_s0 + $0xa0] sm:$0xff]  ;;  %v24_v32 = vld [vmem:[%s862_s0 + $0x50] sm:$0xff] }
   0xc   :  { %132 = vmatpush.msra.mxu0 %v35_v10  ;;  %497 = vmatpush.msra.mxu2 %v35_v10  ;;  %v47_v33 = vld [vmem:[%s863_s2] sm:$0x3] }
   0xd   :  { %212 = vmatpush.msra.mxu1 %v36_v11  ;;  %503 = vmatpush.msra.mxu3 %v36_v11  ;;  %v668_v34 = vperm.slane %v47_v33, 0  ;;  %v670_v35 = vperm.slane %v47_v33, 1 }
   0xe   :  { %450 = vmatmul.msk.f32.vlgmr.msra.gmra.mxu0 %vm53_vm0, %v14_v12  ;;  %461 = vmatmul.msk.f32.vlgmr.msra.gmra.mxu2 %vm53_vm0, %v25_v13 }
   0xf   :  { %471 = vmatmul.msk.f32.vlgmr.msra.gmra.mxu1 %vm53_vm0, %v14_v12  ;;  %482 = vmatmul.msk.f32.vlgmr.msra.gmra.mxu3 %vm53_vm0, %v25_v13 }
  0x16   :  { %451 = vmatmul.msk.f32.gmra.mxu0 %vm53_vm0, %v15_v14  ;;  %462 = vmatmul.msk.f32.gmra.mxu2 %vm53_vm0, %v26_v15 }
  0x17   :  { %472 = vmatmul.msk.f32.gmra.mxu1 %vm53_vm0, %v15_v14  ;;  %483 = vmatmul.msk.f32.gmra.mxu3 %vm53_vm0, %v26_v15 }
  0x1e   :  { %452 = vmatmul.msk.f32.gmra.mxu0 %vm53_vm0, %v16_v16  ;;  %463 = vmatmul.msk.f32.gmra.mxu2 %vm53_vm0, %v27_v17 }
  0x1f   :  { %473 = vmatmul.msk.f32.gmra.mxu1 %vm53_vm0, %v16_v16  ;;  %484 = vmatmul.msk.f32.gmra.mxu3 %vm53_vm0, %v27_v17 }
  0x26   :  { %453 = vmatmul.msk.f32.gmra.mxu0 %vm53_vm0, %v17_v18  ;;  %464 = vmatmul.msk.f32.gmra.mxu2 %vm53_vm0, %v28_v19 }
  0x27   :  { %474 = vmatmul.msk.f32.gmra.mxu1 %vm53_vm0, %v17_v18  ;;  %485 = vmatmul.msk.f32.gmra.mxu3 %vm53_vm0, %v28_v19 }
  0x2e   :  { %454 = vmatmul.msk.f32.gmra.mxu0 %vm53_vm0, %v18_v20  ;;  %465 = vmatmul.msk.f32.gmra.mxu2 %vm53_vm0, %v29_v21 }
  0x2f   :  { %475 = vmatmul.msk.f32.gmra.mxu1 %vm53_vm0, %v18_v20  ;;  %486 = vmatmul.msk.f32.gmra.mxu3 %vm53_vm0, %v29_v21 }
  0x36   :  { %455 = vmatmul.msk.f32.gmra.mxu0 %vm53_vm0, %v19_v22  ;;  %466 = vmatmul.msk.f32.gmra.mxu2 %vm53_vm0, %v30_v23 }
  0x37   :  { %476 = vmatmul.msk.f32.gmra.mxu1 %vm53_vm0, %v19_v22  ;;  %487 = vmatmul.msk.f32.gmra.mxu3 %vm53_vm0, %v30_v23 }
  0x3e   :  { %456 = vmatmul.msk.f32.gmra.mxu0 %vm53_vm0, %v20_v24  ;;  %467 = vmatmul.msk.f32.gmra.mxu2 %vm53_vm0, %v31_v25 }
  0x3f   :  { %477 = vmatmul.msk.f32.gmra.mxu1 %vm53_vm0, %v20_v24  ;;  %488 = vmatmul.msk.f32.gmra.mxu3 %vm53_vm0, %v31_v25 }
  0x46   :  { %457 = vmatmul.msk.f32.gmra.mxu0 %vm53_vm0, %v21_v26  ;;  %468 = vmatmul.msk.f32.gmra.mxu2 %vm53_vm0, %v32_v27 }
  0x47   :  { %478 = vmatmul.msk.f32.gmra.mxu1 %vm53_vm0, %v21_v26  ;;  %489 = vmatmul.msk.f32.gmra.mxu3 %vm53_vm0, %v32_v27 }
  0x4e   :  { %458 = vmatmul.msk.f32.gmra.mxu0 %vm53_vm0, %v22_v28  ;;  %469 = vmatmul.msk.f32.gmra.mxu2 %vm53_vm0, %v33_v29 }
  0x4f   :  { %479 = vmatmul.msk.f32.gmra.mxu1 %vm53_vm0, %v22_v28  ;;  %490 = vmatmul.msk.f32.gmra.mxu3 %vm53_vm0, %v33_v29 }
  0x56   :  { %459 = vmatmul.msk.f32.gmra.mxu0 %vm53_vm0, %v23_v30  ;;  %470 = vmatmul.msk.f32.gmra.mxu2 %vm53_vm0, %v34_v31 }
  0x57   :  { %480 = vmatmul.msk.f32.gmra.mxu1 %vm53_vm0, %v23_v30  ;;  %491 = vmatmul.msk.f32.gmra.mxu3 %vm53_vm0, %v34_v31 }
  0x5e   :  { %460 = vmatmul.msk.f32.gmra.mxu0 %vm53_vm0, %v24_v32 }
  0x5f   :  { %481 = vmatmul.msk.f32.gmra.mxu1 %vm53_vm0, %v24_v32 }
  0x8b   :  { %v134_v36 = vpop.f32.mrf.mxu0 }
  0x8c   :  { %v135_v37 = vadd.f32 %v134_v36, %v668_v34  ;;  %v214_v38 = vpop.f32.mrf.mxu1 }
  0x8d   :  { %v215_v39 = vadd.f32 %v214_v38, %v670_v35 }
  0x8e   :  { %vm277_vm1 = vcmp.gt.f32.partialorder %v135_v37, 0.0  ;;  %v319_v40 = vmul.f32 8.0, %v135_v37 }
  0x8f   :  { %vm278_vm2 = vcmp.gt.f32.partialorder %v215_v39, 0.0  ;;  %v320_v41 = vmul.f32 8.0, %v215_v39 }
  0x90   :  { %v361_v42 = vsel %vm277_vm1, %v135_v37, %v319_v40 }
  0x91   :  { %403 = vst [vmem:[%s864_s3] sm:$0xff] %v361_v42  ;;  %v362_v43 = vsel %vm278_vm2, %v215_v39, %v320_v41  ;;  %v167_v44 = vpop.f32.mrf.mxu2 }
  0x92   :  { %405 = vst.msk [vmem:[%s864_s3 + $0x8] sm:$0xff] %vm404_vm3, %v362_v43  ;;  %v168_v45 = vadd.f32 %v167_v44, %v668_v34  ;;  %v247_v46 = vpop.f32.mrf.mxu3 }
  0x93   :  { %v248_v47 = vadd.f32 %v247_v46, %v670_v35  ;;  %v137_v48 = vpop.f32.mrf.mxu0 }
  0x94   :  { %vm299_vm4 = vcmp.gt.f32.partialorder %v168_v45, 0.0  ;;  %v341_v49 = vmul.f32 8.0, %v168_v45  ;;  %v138_v50 = vadd.f32 %v137_v48, %v668_v34  ;;  %v217_v51 = vpop.f32.mrf.mxu1 }
  0x95   :  { %vm300_vm5 = vcmp.gt.f32.partialorder %v248_v47, 0.0  ;;  %v342_v52 = vmul.f32 8.0, %v248_v47  ;;  %v218_v53 = vadd.f32 %v217_v51, %v670_v35 }
  0x96   :  { %v383_v54 = vsel %vm299_vm4, %v168_v45, %v341_v49  ;;  %vm279_vm6 = vcmp.gt.f32.partialorder %v138_v50, 0.0  ;;  %v321_v55 = vmul.f32 8.0, %v138_v50 }
  0x97   :  { %426 = vst [vmem:[%s864_s3 + $0xb0] sm:$0xff] %v383_v54  ;;  %v384_v56 = vsel %vm300_vm5, %v248_v47, %v342_v52  ;;  %vm280_vm7 = vcmp.gt.f32.partialorder %v218_v53, 0.0  ;;  %v322_v57 = vmul.f32 8.0, %v218_v53 }
  0x98   :  { %427 = vst.msk [vmem:[%s864_s3 + $0xb8] sm:$0xff] %vm404_vm3, %v384_v56  ;;  %v363_v58 = vsel %vm279_vm6, %v138_v50, %v321_v55 }
  0x99   :  { %406 = vst [vmem:[%s864_s3 + $0x10] sm:$0xff] %v363_v58  ;;  %v364_v59 = vsel %vm280_vm7, %v218_v53, %v322_v57  ;;  %v170_v60 = vpop.f32.mrf.mxu2 }
  0x9a   :  { %407 = vst.msk [vmem:[%s864_s3 + $0x18] sm:$0xff] %vm404_vm3, %v364_v59  ;;  %v171_v61 = vadd.f32 %v170_v60, %v668_v34  ;;  %v250_v62 = vpop.f32.mrf.mxu3 }
  0x9b   :  { %v251_v63 = vadd.f32 %v250_v62, %v670_v35  ;;  %v140_v0 = vpop.f32.mrf.mxu0 }
  0x9c   :  { %vm301_vm8 = vcmp.gt.f32.partialorder %v171_v61, 0.0  ;;  %v343_v1 = vmul.f32 8.0, %v171_v61  ;;  %v141_v2 = vadd.f32 %v140_v0, %v668_v34  ;;  %v220_v3 = vpop.f32.mrf.mxu1 }
  0x9d   :  { %vm302_vm9 = vcmp.gt.f32.partialorder %v251_v63, 0.0  ;;  %v344_v4 = vmul.f32 8.0, %v251_v63  ;;  %v221_v5 = vadd.f32 %v220_v3, %v670_v35 }
  0x9e   :  { %v385_v6 = vsel %vm301_vm8, %v171_v61, %v343_v1  ;;  %vm281_vm10 = vcmp.gt.f32.partialorder %v141_v2, 0.0  ;;  %v323_v7 = vmul.f32 8.0, %v141_v2 }
  0x9f   :  { %428 = vst [vmem:[%s864_s3 + $0xc0] sm:$0xff] %v385_v6  ;;  %v386_v8 = vsel %vm302_vm9, %v251_v63, %v344_v4  ;;  %vm282_vm11 = vcmp.gt.f32.partialorder %v221_v5, 0.0  ;;  %v324_v9 = vmul.f32 8.0, %v221_v5 }
  0xa0   :  { %429 = vst.msk [vmem:[%s864_s3 + $0xc8] sm:$0xff] %vm404_vm3, %v386_v8  ;;  %v365_v10 = vsel %vm281_vm10, %v141_v2, %v323_v7 }
  0xa1   :  { %408 = vst [vmem:[%s864_s3 + $0x20] sm:$0xff] %v365_v10  ;;  %v366_v11 = vsel %vm282_vm11, %v221_v5, %v324_v9  ;;  %v173_v12 = vpop.f32.mrf.mxu2 }
  0xa2   :  { %409 = vst.msk [vmem:[%s864_s3 + $0x28] sm:$0xff] %vm404_vm3, %v366_v11  ;;  %v174_v13 = vadd.f32 %v173_v12, %v668_v34  ;;  %v253_v14 = vpop.f32.mrf.mxu3 }
  0xa3   :  { %v254_v15 = vadd.f32 %v253_v14, %v670_v35  ;;  %v143_v16 = vpop.f32.mrf.mxu0 }
  0xa4   :  { %vm303_vm12 = vcmp.gt.f32.partialorder %v174_v13, 0.0  ;;  %v345_v17 = vmul.f32 8.0, %v174_v13  ;;  %v144_v18 = vadd.f32 %v143_v16, %v668_v34  ;;  %v223_v19 = vpop.f32.mrf.mxu1 }
  0xa5   :  { %vm304_vm13 = vcmp.gt.f32.partialorder %v254_v15, 0.0  ;;  %v346_v20 = vmul.f32 8.0, %v254_v15  ;;  %v224_v21 = vadd.f32 %v223_v19, %v670_v35 }
  0xa6   :  { %v387_v22 = vsel %vm303_vm12, %v174_v13, %v345_v17  ;;  %vm283_vm14 = vcmp.gt.f32.partialorder %v144_v18, 0.0  ;;  %v325_v23 = vmul.f32 8.0, %v144_v18 }
  0xa7   :  { %430 = vst [vmem:[%s864_s3 + $0xd0] sm:$0xff] %v387_v22  ;;  %v388_v24 = vsel %vm304_vm13, %v254_v15, %v346_v20  ;;  %vm284_vm15 = vcmp.gt.f32.partialorder %v224_v21, 0.0  ;;  %v326_v25 = vmul.f32 8.0, %v224_v21 }
  0xa8   :  { %431 = vst.msk [vmem:[%s864_s3 + $0xd8] sm:$0xff] %vm404_vm3, %v388_v24  ;;  %v367_v26 = vsel %vm283_vm14, %v144_v18, %v325_v23 }
  0xa9   :  { %410 = vst [vmem:[%s864_s3 + $0x30] sm:$0xff] %v367_v26  ;;  %v368_v27 = vsel %vm284_vm15, %v224_v21, %v326_v25  ;;  %v176_v28 = vpop.f32.mrf.mxu2 }
  0xaa   :  { %411 = vst.msk [vmem:[%s864_s3 + $0x38] sm:$0xff] %vm404_vm3, %v368_v27  ;;  %v177_v29 = vadd.f32 %v176_v28, %v668_v34  ;;  %v256_v30 = vpop.f32.mrf.mxu3 }
  0xab   :  { %v257_v31 = vadd.f32 %v256_v30, %v670_v35  ;;  %v146_v32 = vpop.f32.mrf.mxu0 }
  0xac   :  { %vm305_vm0 = vcmp.gt.f32.partialorder %v177_v29, 0.0  ;;  %v347_v33 = vmul.f32 8.0, %v177_v29  ;;  %v147_v36 = vadd.f32 %v146_v32, %v668_v34  ;;  %v226_v37 = vpop.f32.mrf.mxu1 }
  0xad   :  { %vm306_vm1 = vcmp.gt.f32.partialorder %v257_v31, 0.0  ;;  %v348_v38 = vmul.f32 8.0, %v257_v31  ;;  %v227_v39 = vadd.f32 %v226_v37, %v670_v35 }
  0xae   :  { %v389_v40 = vsel %vm305_vm0, %v177_v29, %v347_v33  ;;  %vm285_vm2 = vcmp.gt.f32.partialorder %v147_v36, 0.0  ;;  %v327_v41 = vmul.f32 8.0, %v147_v36 }
  0xaf   :  { %432 = vst [vmem:[%s864_s3 + $0xe0] sm:$0xff] %v389_v40  ;;  %v390_v42 = vsel %vm306_vm1, %v257_v31, %v348_v38  ;;  %vm286_vm4 = vcmp.gt.f32.partialorder %v227_v39, 0.0  ;;  %v328_v43 = vmul.f32 8.0, %v227_v39 }
  0xb0   :  { %433 = vst.msk [vmem:[%s864_s3 + $0xe8] sm:$0xff] %vm404_vm3, %v390_v42  ;;  %v369_v44 = vsel %vm285_vm2, %v147_v36, %v327_v41 }
  0xb1   :  { %412 = vst [vmem:[%s864_s3 + $0x40] sm:$0xff] %v369_v44  ;;  %v370_v45 = vsel %vm286_vm4, %v227_v39, %v328_v43  ;;  %v179_v46 = vpop.f32.mrf.mxu2 }
  0xb2   :  { %413 = vst.msk [vmem:[%s864_s3 + $0x48] sm:$0xff] %vm404_vm3, %v370_v45  ;;  %v180_v47 = vadd.f32 %v179_v46, %v668_v34  ;;  %v259_v48 = vpop.f32.mrf.mxu3 }
  0xb3   :  { %v260_v49 = vadd.f32 %v259_v48, %v670_v35  ;;  %v149_v50 = vpop.f32.mrf.mxu0 }
  0xb4   :  { %vm307_vm5 = vcmp.gt.f32.partialorder %v180_v47, 0.0  ;;  %v349_v51 = vmul.f32 8.0, %v180_v47  ;;  %v150_v52 = vadd.f32 %v149_v50, %v668_v34  ;;  %v229_v53 = vpop.f32.mrf.mxu1 }
  0xb5   :  { %vm308_vm6 = vcmp.gt.f32.partialorder %v260_v49, 0.0  ;;  %v350_v54 = vmul.f32 8.0, %v260_v49  ;;  %v230_v55 = vadd.f32 %v229_v53, %v670_v35 }
  0xb6   :  { %v391_v56 = vsel %vm307_vm5, %v180_v47, %v349_v51  ;;  %vm287_vm7 = vcmp.gt.f32.partialorder %v150_v52, 0.0  ;;  %v329_v57 = vmul.f32 8.0, %v150_v52 }
  0xb7   :  { %434 = vst [vmem:[%s864_s3 + $0xf0] sm:$0xff] %v391_v56  ;;  %v392_v58 = vsel %vm308_vm6, %v260_v49, %v350_v54  ;;  %vm288_vm8 = vcmp.gt.f32.partialorder %v230_v55, 0.0  ;;  %v330_v59 = vmul.f32 8.0, %v230_v55 }
  0xb8   :  { %435 = vst.msk [vmem:[%s864_s3 + $0xf8] sm:$0xff] %vm404_vm3, %v392_v58  ;;  %v371_v60 = vsel %vm287_vm7, %v150_v52, %v329_v57 }
  0xb9   :  { %414 = vst [vmem:[%s864_s3 + $0x50] sm:$0xff] %v371_v60  ;;  %v372_v61 = vsel %vm288_vm8, %v230_v55, %v330_v59  ;;  %v182_v62 = vpop.f32.mrf.mxu2 }
  0xba   :  { %415 = vst.msk [vmem:[%s864_s3 + $0x58] sm:$0xff] %vm404_vm3, %v372_v61  ;;  %v183_v63 = vadd.f32 %v182_v62, %v668_v34  ;;  %v262_v0 = vpop.f32.mrf.mxu3 }
  0xbb   :  { %v263_v1 = vadd.f32 %v262_v0, %v670_v35  ;;  %v152_v2 = vpop.f32.mrf.mxu0 }
  0xbc   :  { %vm309_vm9 = vcmp.gt.f32.partialorder %v183_v63, 0.0  ;;  %v351_v3 = vmul.f32 8.0, %v183_v63  ;;  %v153_v4 = vadd.f32 %v152_v2, %v668_v34  ;;  %v232_v5 = vpop.f32.mrf.mxu1 }
  0xbd   :  { %vm310_vm10 = vcmp.gt.f32.partialorder %v263_v1, 0.0  ;;  %v352_v6 = vmul.f32 8.0, %v263_v1  ;;  %v233_v7 = vadd.f32 %v232_v5, %v670_v35 }
  0xbe   :  { %v393_v8 = vsel %vm309_vm9, %v183_v63, %v351_v3  ;;  %vm289_vm11 = vcmp.gt.f32.partialorder %v153_v4, 0.0  ;;  %v331_v9 = vmul.f32 8.0, %v153_v4 }
  0xbf   :  { %436 = vst [vmem:[%s864_s3 + $0x100] sm:$0xff] %v393_v8  ;;  %v394_v10 = vsel %vm310_vm10, %v263_v1, %v352_v6  ;;  %vm290_vm12 = vcmp.gt.f32.partialorder %v233_v7, 0.0  ;;  %v332_v11 = vmul.f32 8.0, %v233_v7 }
  0xc0   :  { %437 = vst.msk [vmem:[%s864_s3 + $0x108] sm:$0xff] %vm404_vm3, %v394_v10  ;;  %v373_v12 = vsel %vm289_vm11, %v153_v4, %v331_v9 }
  0xc1   :  { %416 = vst [vmem:[%s864_s3 + $0x60] sm:$0xff] %v373_v12  ;;  %v374_v13 = vsel %vm290_vm12, %v233_v7, %v332_v11  ;;  %v185_v14 = vpop.f32.mrf.mxu2 }
  0xc2   :  { %417 = vst.msk [vmem:[%s864_s3 + $0x68] sm:$0xff] %vm404_vm3, %v374_v13  ;;  %v186_v15 = vadd.f32 %v185_v14, %v668_v34  ;;  %v265_v16 = vpop.f32.mrf.mxu3 }
  0xc3   :  { %v266_v17 = vadd.f32 %v265_v16, %v670_v35  ;;  %v155_v18 = vpop.f32.mrf.mxu0 }
  0xc4   :  { %vm311_vm13 = vcmp.gt.f32.partialorder %v186_v15, 0.0  ;;  %v353_v19 = vmul.f32 8.0, %v186_v15  ;;  %v156_v20 = vadd.f32 %v155_v18, %v668_v34  ;;  %v235_v21 = vpop.f32.mrf.mxu1 }
  0xc5   :  { %vm312_vm14 = vcmp.gt.f32.partialorder %v266_v17, 0.0  ;;  %v354_v22 = vmul.f32 8.0, %v266_v17  ;;  %v236_v23 = vadd.f32 %v235_v21, %v670_v35 }
  0xc6   :  { %v395_v24 = vsel %vm311_vm13, %v186_v15, %v353_v19  ;;  %vm291_vm15 = vcmp.gt.f32.partialorder %v156_v20, 0.0  ;;  %v333_v25 = vmul.f32 8.0, %v156_v20 }
  0xc7   :  { %438 = vst [vmem:[%s864_s3 + $0x110] sm:$0xff] %v395_v24  ;;  %v396_v26 = vsel %vm312_vm14, %v266_v17, %v354_v22  ;;  %vm292_vm0 = vcmp.gt.f32.partialorder %v236_v23, 0.0  ;;  %v334_v27 = vmul.f32 8.0, %v236_v23 }
  0xc8   :  { %439 = vst.msk [vmem:[%s864_s3 + $0x118] sm:$0xff] %vm404_vm3, %v396_v26  ;;  %v375_v28 = vsel %vm291_vm15, %v156_v20, %v333_v25 }
  0xc9   :  { %418 = vst [vmem:[%s864_s3 + $0x70] sm:$0xff] %v375_v28  ;;  %v376_v29 = vsel %vm292_vm0, %v236_v23, %v334_v27  ;;  %v188_v30 = vpop.f32.mrf.mxu2 }
  0xca   :  { %419 = vst.msk [vmem:[%s864_s3 + $0x78] sm:$0xff] %vm404_vm3, %v376_v29  ;;  %v189_v31 = vadd.f32 %v188_v30, %v668_v34  ;;  %v268_v32 = vpop.f32.mrf.mxu3 }
  0xcb   :  { %v269_v33 = vadd.f32 %v268_v32, %v670_v35  ;;  %v158_v36 = vpop.f32.mrf.mxu0 }
  0xcc   :  { %vm313_vm1 = vcmp.gt.f32.partialorder %v189_v31, 0.0  ;;  %v355_v37 = vmul.f32 8.0, %v189_v31  ;;  %v159_v38 = vadd.f32 %v158_v36, %v668_v34  ;;  %v238_v39 = vpop.f32.mrf.mxu1 }
  0xcd   :  { %vm314_vm2 = vcmp.gt.f32.partialorder %v269_v33, 0.0  ;;  %v356_v40 = vmul.f32 8.0, %v269_v33  ;;  %v239_v41 = vadd.f32 %v238_v39, %v670_v35 }
  0xce   :  { %v397_v42 = vsel %vm313_vm1, %v189_v31, %v355_v37  ;;  %vm293_vm4 = vcmp.gt.f32.partialorder %v159_v38, 0.0  ;;  %v335_v43 = vmul.f32 8.0, %v159_v38 }
  0xcf   :  { %440 = vst [vmem:[%s864_s3 + $0x120] sm:$0xff] %v397_v42  ;;  %v398_v44 = vsel %vm314_vm2, %v269_v33, %v356_v40  ;;  %vm294_vm5 = vcmp.gt.f32.partialorder %v239_v41, 0.0  ;;  %v336_v45 = vmul.f32 8.0, %v239_v41 }
  0xd0   :  { %441 = vst.msk [vmem:[%s864_s3 + $0x128] sm:$0xff] %vm404_vm3, %v398_v44  ;;  %v377_v46 = vsel %vm293_vm4, %v159_v38, %v335_v43 }
  0xd1   :  { %420 = vst [vmem:[%s864_s3 + $0x80] sm:$0xff] %v377_v46  ;;  %v378_v47 = vsel %vm294_vm5, %v239_v41, %v336_v45  ;;  %v191_v48 = vpop.f32.mrf.mxu2 }
  0xd2   :  { %421 = vst.msk [vmem:[%s864_s3 + $0x88] sm:$0xff] %vm404_vm3, %v378_v47  ;;  %v192_v49 = vadd.f32 %v191_v48, %v668_v34  ;;  %v271_v50 = vpop.f32.mrf.mxu3 }
  0xd3   :  { %v272_v51 = vadd.f32 %v271_v50, %v670_v35  ;;  %v161_v52 = vpop.f32.mrf.mxu0 }
  0xd4   :  { %vm315_vm6 = vcmp.gt.f32.partialorder %v192_v49, 0.0  ;;  %v357_v53 = vmul.f32 8.0, %v192_v49  ;;  %v162_v54 = vadd.f32 %v161_v52, %v668_v34  ;;  %v241_v55 = vpop.f32.mrf.mxu1 }
  0xd5   :  { %vm316_vm7 = vcmp.gt.f32.partialorder %v272_v51, 0.0  ;;  %v358_v56 = vmul.f32 8.0, %v272_v51  ;;  %v242_v57 = vadd.f32 %v241_v55, %v670_v35 }
  0xd6   :  { %v399_v58 = vsel %vm315_vm6, %v192_v49, %v357_v53  ;;  %vm295_vm8 = vcmp.gt.f32.partialorder %v162_v54, 0.0  ;;  %v337_v59 = vmul.f32 8.0, %v162_v54 }
  0xd7   :  { %442 = vst [vmem:[%s864_s3 + $0x130] sm:$0xff] %v399_v58  ;;  %v400_v60 = vsel %vm316_vm7, %v272_v51, %v358_v56  ;;  %vm296_vm9 = vcmp.gt.f32.partialorder %v242_v57, 0.0  ;;  %v338_v61 = vmul.f32 8.0, %v242_v57 }
  0xd8   :  { %443 = vst.msk [vmem:[%s864_s3 + $0x138] sm:$0xff] %vm404_vm3, %v400_v60  ;;  %v379_v62 = vsel %vm295_vm8, %v162_v54, %v337_v59 }
  0xd9   :  { %422 = vst [vmem:[%s864_s3 + $0x90] sm:$0xff] %v379_v62  ;;  %v380_v63 = vsel %vm296_vm9, %v242_v57, %v338_v61  ;;  %v194_v0 = vpop.f32.mrf.mxu2 }
  0xda   :  { %423 = vst.msk [vmem:[%s864_s3 + $0x98] sm:$0xff] %vm404_vm3, %v380_v63  ;;  %v195_v1 = vadd.f32 %v194_v0, %v668_v34  ;;  %v274_v2 = vpop.f32.mrf.mxu3 }
  0xdb   :  { %v275_v3 = vadd.f32 %v274_v2, %v670_v35  ;;  %v164_v4 = vpop.f32.mrf.mxu0 }
  0xdc   :  { %vm317_vm10 = vcmp.gt.f32.partialorder %v195_v1, 0.0  ;;  %v359_v5 = vmul.f32 8.0, %v195_v1  ;;  %v165_v6 = vadd.f32 %v164_v4, %v668_v34  ;;  %v244_v7 = vpop.f32.mrf.mxu1 }
  0xdd   :  { %vm318_vm11 = vcmp.gt.f32.partialorder %v275_v3, 0.0  ;;  %v360_v8 = vmul.f32 8.0, %v275_v3  ;;  %v245_v9 = vadd.f32 %v244_v7, %v670_v35 }
  0xde   :  { %v401_v10 = vsel %vm317_vm10, %v195_v1, %v359_v5  ;;  %vm297_vm12 = vcmp.gt.f32.partialorder %v165_v6, 0.0  ;;  %v339_v11 = vmul.f32 8.0, %v165_v6 }
  0xdf   :  { %444 = vst [vmem:[%s864_s3 + $0x140] sm:$0xff] %v401_v10  ;;  %v402_v12 = vsel %vm318_vm11, %v275_v3, %v360_v8  ;;  %vm298_vm13 = vcmp.gt.f32.partialorder %v245_v9, 0.0  ;;  %v340_v13 = vmul.f32 8.0, %v245_v9 }
  0xe0   :  { %445 = vst.msk [vmem:[%s864_s3 + $0x148] sm:$0xff] %vm404_vm3, %v402_v12  ;;  %v381_v34 = vsel %vm297_vm12, %v165_v6, %v339_v11 }
  0xe1   :  { %424 = vst [vmem:[%s864_s3 + $0xa0] sm:$0xff] %v381_v34  ;;  %v382_v35 = vsel %vm298_vm13, %v245_v9, %v340_v13 }
  0xe2   :  { %425 = vst.msk [vmem:[%s864_s3 + $0xa8] sm:$0xff] %vm404_vm3, %v382_v35 }

</bundles_post_ra>
